<compile_context>
chip_gen: v5e
topology: v5e:2x2
jax: 0.10.0
libtpu: 0.0.40
codegen_flags: <defaults>
</compile_context>

<pallas_src>
import functools

import jax
import jax.numpy as jnp
from jax.experimental import pallas as pl
from jax.experimental.pallas import tpu as pltpu

EPS = 1e-5  # nn.LayerNorm default eps


def _round_up(x, m):
    return ((x + m - 1) // m) * m


def _vmem_budget_bytes():
    """(tile budget for in-flight buffers, scoped vmem limit or None) per TPU generation."""
    kind = ""
    try:
        kind = jax.devices()[0].device_kind.lower()
    except Exception:
        pass
    if "v7" in kind:
        # v7x: 64 MiB physical VMEM per TensorCore -> tighter tiles + modest scoped-limit raise.
        return 24 << 20, 48 << 20
    if "v4" in kind or "v5" in kind or "v6" in kind:
        # v5e/v6e (and v4/v5p): 128 MiB physical -> big tiles; raise the 16/32 MiB scoped default.
        return 48 << 20, 100 << 20
    # Unknown / older generation: stay under the default scoped VMEM and don't touch the limit.
    return 8 << 20, None


def _pick_row_tile(R, H_pad, itemsize, budget_bytes):
    """Largest sublane-aligned row tile whose double-buffered buffers + f32 temps fit the budget."""
    sub = 8 if itemsize >= 4 else 16
    # In flight per row: 2 (double buffer) x 3 arrays (x, y, out) x itemsize + ~8 B of f32 temps.
    per_row = H_pad * (6 * itemsize + 8)
    rt = max(sub, (budget_bytes // per_row) // sub * sub)
    rt = min(rt, 1024)
    r_up = _round_up(R, sub)
    # Keep >= 2 grid steps when there is enough work: enables software pipelining and lets the
    # "parallel" grid axis be split across the two TensorCores on v7x.
    if r_up >= 2 * sub:
        rt = min(rt, max(sub, _round_up((r_up + 1) // 2, sub)))
    return min(rt, r_up)


def add_layernorm_kernel(x_ref, y_ref, g_ref, b_ref, o_ref, *, h_true):
    # z = x + dropout(sub_layer(...)); dropout p=0 -> identity, so y == sublayer output.
    z = x_ref[...].astype(jnp.float32) + y_ref[...].astype(jnp.float32)
    inv_h = 1.0 / h_true
    # Single pass: the two cross-lane reductions are independent (free ILP under the DMA).
    # Zero-padded lanes (if H was padded to a multiple of 128) contribute 0 to both sums.
    s1 = jnp.sum(z, axis=-1, keepdims=True)
    s2 = jnp.sum(z * z, axis=-1, keepdims=True)
    mean = s1 * inv_h
    var = jnp.maximum(s2 * inv_h - mean * mean, 0.0)
    inv = jax.lax.rsqrt(var + EPS)
    out = (z - mean) * inv * g_ref[...].astype(jnp.float32) + b_ref[...].astype(jnp.float32)
    o_ref[...] = out.astype(o_ref.dtype)


def add_layernorm(x, sub_out, gamma, beta, *, row_tile=None):
    """LayerNorm(x + sub_out) over the last axis, with per-feature affine (gamma, beta)."""
    orig_shape = x.shape
    H = orig_shape[-1]
    x2 = x.reshape(-1, H)
    y2 = sub_out.reshape(-1, H)
    R = x2.shape[0]

    itemsize = jnp.dtype(x.dtype).itemsize
    sub = 8 if itemsize >= 4 else 16
    H_pad = _round_up(H, 128)                      # lane-dense stores (vst, not vst.msk)
    budget, vmem_limit = _vmem_budget_bytes()
    if row_tile is None:
        row_tile = _pick_row_tile(R, H_pad, itemsize, budget)
    row_tile = max(sub, _round_up(row_tile, sub))
    R_pad = _round_up(R, row_tile)                 # no divisibility requirement on callers

    g2 = gamma.reshape(1, H)
    b2 = beta.reshape(1, H)
    if H_pad != H:
        # Zero padding keeps sum(z) / sum(z*z) exact; padded lanes are sliced off below.
        x2 = jnp.pad(x2, ((0, 0), (0, H_pad - H)))
        y2 = jnp.pad(y2, ((0, 0), (0, H_pad - H)))
        g2 = jnp.pad(g2, ((0, 0), (0, H_pad - H)))
        b2 = jnp.pad(b2, ((0, 0), (0, H_pad - H)))
    if R_pad != R:
        x2 = jnp.pad(x2, ((0, R_pad - R), (0, 0)))
        y2 = jnp.pad(y2, ((0, R_pad - R), (0, 0)))

    grid = (R_pad // row_tile,)

    cp_kwargs = dict(dimension_semantics=("parallel",))
    if vmem_limit is not None:
        cp_kwargs["vmem_limit_bytes"] = int(vmem_limit)

    cost = pl.CostEstimate(
        flops=8 * R_pad * H_pad,
        transcendentals=R_pad,                     # one rsqrt per row
        bytes_accessed=(3 * R_pad * H_pad + 2 * H_pad) * itemsize,
    )

    out = pl.pallas_call(
        functools.partial(add_layernorm_kernel, h_true=float(H)),
        out_shape=jax.ShapeDtypeStruct((R_pad, H_pad), x.dtype),
        grid=grid,
        in_specs=[
            pl.BlockSpec((row_tile, H_pad), lambda i: (i, 0)),
            pl.BlockSpec((row_tile, H_pad), lambda i: (i, 0)),
            pl.BlockSpec((1, H_pad), lambda i: (0, 0)),
            pl.BlockSpec((1, H_pad), lambda i: (0, 0)),
        ],
        out_specs=pl.BlockSpec((row_tile, H_pad), lambda i: (i, 0)),
        compiler_params=pltpu.CompilerParams(**cp_kwargs),
        cost_estimate=cost,
    )(x2, y2, g2, b2)

    out = out[:R, :H]
    return out.reshape(orig_shape)


def sublayer_res_connection(x, sub_layer, mask, gamma, beta):
    """Mirrors SublayeResConnection.forward: norm(x + Dropout(sub_layer(x[, mask]))), p=0."""
    sub_out = sub_layer(x, mask) if mask is not None else sub_layer(x)
    return add_layernorm(x, sub_out, gamma, beta)


if __name__ == "__main__":
    key = jax.random.PRNGKey(0)

    def ref_ln(x, sub_out, gamma, beta):
        z = x + sub_out
        m = z.mean(-1, keepdims=True)
        v = ((z - m) ** 2).mean(-1, keepdims=True)
        return (z - m) / jnp.sqrt(v + EPS) * gamma + beta

    # --- case 1: lane-dense hidden size, masked sub_layer -------------------------------------
    B, S, H = 2, 8, 128
    kx, kw, kb, km = jax.random.split(key, 4)
    x = jax.random.normal(kx, (B, S, H), dtype=jnp.float32)
    W = jax.random.normal(kw, (H, H), dtype=jnp.float32) / jnp.sqrt(H)
    bW = 0.1 * jax.random.normal(kb, (H,), dtype=jnp.float32)
    mask = (jax.random.uniform(km, (B, S, 1)) > 0.5).astype(jnp.float32)

    def sub_layer(x, mask):
        return (x @ W + bW) * mask

    gamma = jnp.ones((H,), dtype=jnp.float32)   # nn.LayerNorm default init: weight=1, bias=0
    beta = jnp.zeros((H,), dtype=jnp.float32)

    out = sublayer_res_connection(x, sub_layer, mask, gamma, beta)
    out = jax.block_until_ready(out)
    ref = ref_ln(x, sub_layer(x, mask), gamma, beta)
    assert jnp.allclose(out, ref, atol=1e-4, rtol=1e-4), "case 1 mismatch vs reference"

    # --- case 2: ragged row count + H not a multiple of 128, mask=None branch -----------------
    B2, S2, H2 = 2, 7, 32
    kx2, kw2 = jax.random.split(kx)
    x_s = jax.random.normal(kx2, (B2, S2, H2), dtype=jnp.float32)
    W2 = jax.random.normal(kw2, (H2, H2), dtype=jnp.float32) / jnp.sqrt(H2)

    def sub_layer2(x):
        return jnp.tanh(x @ W2)

    gamma2 = jnp.ones((H2,), dtype=jnp.float32)
    beta2 = jnp.zeros((H2,), dtype=jnp.float32)

    out2 = sublayer_res_connection(x_s, sub_layer2, None, gamma2, beta2)
    out2 = jax.block_until_ready(out2)
    ref2 = ref_ln(x_s, sub_layer2(x_s), gamma2, beta2)
    assert jnp.allclose(out2, ref2, atol=1e-4, rtol=1e-4), "case 2 mismatch vs reference"

    print("KERNEL_OK")
</pallas_src>

<mosaic_0001>
module attributes {stable_mosaic.version = 11 : i64} {
  func.func @add_layernorm_kernel(%arg0: i32, %arg1: memref<8x128xf32, #tpu.memory_space<vmem>>, %arg2: memref<8x128xf32, #tpu.memory_space<vmem>>, %arg3: memref<1x128xf32, #tpu.memory_space<vmem>>, %arg4: memref<1x128xf32, #tpu.memory_space<vmem>>, %arg5: memref<8x128xf32, #tpu.memory_space<vmem>>) attributes {dimension_semantics = [#tpu.dimension_semantics<parallel>], iteration_bounds = array<i64: 2>, scalar_prefetch = 0 : i64, scratch_operands = 0 : i64, tpu.core_type = #tpu.core_type<tc>, window_params = [{transform_indices = @transform_0, window_bounds = array<i64: 8, 128>}, {transform_indices = @transform_1, window_bounds = array<i64: 8, 128>}, {pipeline_mode = #tpu.pipeline_mode<synchronous>, transform_indices = @transform_2, window_bounds = array<i64: 1, 128>}, {pipeline_mode = #tpu.pipeline_mode<synchronous>, transform_indices = @transform_3, window_bounds = array<i64: 1, 128>}, {transform_indices = @transform_4, window_bounds = array<i64: 8, 128>}]} {
    %c0 = arith.constant 0 : index
    %c0_0 = arith.constant 0 : index
    %0 = vector.load %arg1[%c0, %c0_0] : memref<8x128xf32, #tpu.memory_space<vmem>>, vector<8x128xf32>
    %c0_1 = arith.constant 0 : index
    %c0_2 = arith.constant 0 : index
    %1 = vector.load %arg2[%c0_1, %c0_2] : memref<8x128xf32, #tpu.memory_space<vmem>>, vector<8x128xf32>
    %2 = arith.addf %0, %1 : vector<8x128xf32>
    %cst = arith.constant dense<0.000000e+00> : vector<8xf32>
    %3 = vector.multi_reduction <add>, %2, %cst [1] : vector<8x128xf32> to vector<8xf32>
    %4 = vector.shape_cast %3 : vector<8xf32> to vector<8x1xf32>
    %5 = arith.mulf %2, %2 : vector<8x128xf32>
    %cst_3 = arith.constant dense<0.000000e+00> : vector<8xf32>
    %6 = vector.multi_reduction <add>, %5, %cst_3 [1] : vector<8x128xf32> to vector<8xf32>
    %7 = vector.shape_cast %6 : vector<8xf32> to vector<8x1xf32>
    %cst_4 = arith.constant 7.812500e-03 : f32
    %8 = vector.broadcast %cst_4 : f32 to vector<8x1xf32>
    %9 = arith.mulf %4, %8 : vector<8x1xf32>
    %cst_5 = arith.constant 7.812500e-03 : f32
    %10 = vector.broadcast %cst_5 : f32 to vector<8x1xf32>
    %11 = arith.mulf %7, %10 : vector<8x1xf32>
    %12 = arith.mulf %9, %9 : vector<8x1xf32>
    %13 = arith.subf %11, %12 : vector<8x1xf32>
    %cst_6 = arith.constant 0.000000e+00 : f32
    %14 = vector.broadcast %cst_6 : f32 to vector<8x1xf32>
    %15 = arith.maximumf %13, %14 : vector<8x1xf32>
    %cst_7 = arith.constant 9.99999974E-6 : f32
    %16 = vector.broadcast %cst_7 : f32 to vector<8x1xf32>
    %17 = arith.addf %15, %16 : vector<8x1xf32>
    %18 = math.rsqrt %17 : vector<8x1xf32>
    %19 = vector.broadcast %9 : vector<8x1xf32> to vector<8x128xf32>
    %20 = arith.subf %2, %19 : vector<8x128xf32>
    %21 = vector.broadcast %18 : vector<8x1xf32> to vector<8x128xf32>
    %22 = arith.mulf %20, %21 : vector<8x128xf32>
    %c0_8 = arith.constant 0 : index
    %c0_9 = arith.constant 0 : index
    %23 = vector.load %arg3[%c0_8, %c0_9] : memref<1x128xf32, #tpu.memory_space<vmem>>, vector<1x128xf32>
    %24 = vector.broadcast %23 : vector<1x128xf32> to vector<8x128xf32>
    %25 = arith.mulf %22, %24 : vector<8x128xf32>
    %c0_10 = arith.constant 0 : index
    %c0_11 = arith.constant 0 : index
    %26 = vector.load %arg4[%c0_10, %c0_11] : memref<1x128xf32, #tpu.memory_space<vmem>>, vector<1x128xf32>
    %27 = vector.broadcast %26 : vector<1x128xf32> to vector<8x128xf32>
    %28 = arith.addf %25, %27 : vector<8x128xf32>
    %c0_12 = arith.constant 0 : index
    %c0_13 = arith.constant 0 : index
    %29 = vector.load %arg5[%c0_12, %c0_13] : memref<8x128xf32, #tpu.memory_space<vmem>>, vector<8x128xf32>
    tpu.vector_store %arg5[%c0_12, %c0_13], %28 {strides = array<i32>} : memref<8x128xf32, #tpu.memory_space<vmem>>, vector<8x128xf32>,
    return
  }
  func.func @transform_0(%arg0: i32) -> (i32, i32) {
    %c0_i32 = arith.constant 0 : i32
    %c0_i32_0 = arith.constant 0 : i32
    return %arg0, %c0_i32 : i32, i32
  }
  func.func @transform_1(%arg0: i32) -> (i32, i32) {
    %c0_i32 = arith.constant 0 : i32
    %c0_i32_0 = arith.constant 0 : i32
    return %arg0, %c0_i32 : i32, i32
  }
  func.func @transform_2(%arg0: i32) -> (i32, i32) {
    %c0_i32 = arith.constant 0 : i32
    %c0_i32_0 = arith.constant 0 : i32
    %c0_i32_1 = arith.constant 0 : i32
    return %c0_i32, %c0_i32_0 : i32, i32
  }
  func.func @transform_3(%arg0: i32) -> (i32, i32) {
    %c0_i32 = arith.constant 0 : i32
    %c0_i32_0 = arith.constant 0 : i32
    %c0_i32_1 = arith.constant 0 : i32
    return %c0_i32, %c0_i32_0 : i32, i32
  }
  func.func @transform_4(%arg0: i32) -> (i32, i32) {
    %c0_i32 = arith.constant 0 : i32
    %c0_i32_0 = arith.constant 0 : i32
    return %arg0, %c0_i32 : i32, i32
  }
}

</mosaic_0001>

<bundles_post_ra>
// kernel: tpu_custom_call.1
= control target key start
LH: loop header
LB: loop body
LE: loop exit
PB: predicated region body
PF: predicated region fallthrough
CT: control target
= control target key end

     0   :  { %s798_s0 = inlined_call_operand.hbm [shape: f32[16,128], index: 0, kind: input, shape index: {}]   ;;  %s799_s1 = inlined_call_operand.hbm [shape: f32[16,128], index: 1, kind: input, shape index: {}]   ;;  %s800_s2 = inlined_call_operand.vmem [shape: f32[1,128], index: 2, kind: input, shape index: {}]   ;;  %s801_s3 = inlined_call_operand.vmem [shape: f32[1,128], index: 3, kind: input, shape index: {}]   ;;  %s802_s4 = inlined_call_operand.hbm [shape: f32[16,128], index: 4, kind: output, shape index: {}]  }
   0x1   :  { %803 = sst [smem:[#allocation11_spill]] %s798_s0 }
   0x2   :  { %9 = vsyncpa [#allocation3], 0 }
   0x3   :  { %11 = vsyncpa [#allocation3 + $0x1], 0 }
   0x4   :  { %12 = vsyncpa [#allocation6], 0 }
   0x5   :  { %14 = vsyncpa [#allocation6 + $0x1], 0 }
   0x6   :  { %15 = vsyncpa [#allocation4], 0 }
   0x7   :  { %17 = vsyncpa [#allocation4 + $0x1], 0  ;;  %s627_s15 = smov 0   ;;  %s629_s16 = smov 0  }
   0x8   :  { %s631_s17 = smov 0   ;;  %s633_s18 = smov 0  }
   0x9 LB: > { %s648_s19 = sadd.s32 4294967295, %s600_s18   ;;  %s400_s20 = sadd.s32 4294967294, %s600_s18   ;;  %s600_s18 = sphi %s633_s18, %s815_s18   ;;  %s596_s17 = sphi %s631_s17, %s814_s17   ;;  %s592_s16 = sphi %s629_s16, %s813_s16   ;;  %s588_s15 = sphi %s627_s15, %s812_s15  }
   0xa   : > { %s652_s21 = sadd.s32 1, %s600_s18   ;;  %s30_s22 = sadd.s32 1, %s596_s17 }
   0xb   : > { %s27_s23 = ssub.s32 %s600_s18, %s652_s21  ;;  %p37_p0 = scmp.ne.s32.totalorder %s596_s17, %s592_s16 }
   0xc   : > { %p28_p1 = scmp.eq.s32.totalorder %s27_s23, 0  ;;  %p38_p2 = scmp.eq.s32.totalorder %s600_s18, 0 }
   0xd   : > { %p43_p3 = scmp.ne.s32.totalorder %s592_s16, %s588_s15  ;;  %p44_p4 = scmp.eq.s32.totalorder %s648_s19, 0 }
   0xe   : > { %s664_s24 = scalar_select %p28_p1, %s596_s17, %s30_s22  }
   0xf   : > { %p666_p5 = por %p38_p2, %p37_p0  ;;  %p670_p6 = por %p44_p4, %p43_p3 }
  0x10   : > { %p135_p7 = scmp.eq.s32.totalorder %s648_s19, 1  ;;  %p141_p8 = scmp.eq.s32.totalorder %s400_s20, 1 }
  0x11   : > { %p432_p10 = scmp.lt.s32.totalorder %s600_s18, 2  ;;  %s686_s29 = sand.u32 1, %s596_s17  }
  0x12   : > { %p677_p11 = por %p135_p7, %p37_p0  ;;  %p681_p12 = por %p141_p8, %p43_p3 }
  0x13   : > { %s404_s30 = sshll.u32 %s600_s18, 3  ;;  %s403_s5 = sshll.u32 %s686_s29, 3 }
  0x14   : > { %s808_s0 = sld [smem:[#allocation11_spill]]  ;;  %s171_s10 = scalar_lea.vmem [#allocation2], %s403_s5 }
  0x15   : > { %s179_s11 = sshll.u32 %s171_s10, 4  ;;  %p695_p13 = pnand %p432_p10, %p666_p5  ;;  %s180_s11 = int_to_ptr.vmem [resolvable:$true] %s179_s11 }
  0x16   : > { %p407_p0 = scmp.ge.s32.totalorder %s600_s18, 1  ;;  %p203_p1 = scmp.lt.s32.totalorder %s600_s18, 3 }
  0x17   : > { %s168_s13 = scalar_lea.sflag [#allocation3], %s686_s29  ;;  %p474_p3 = pneg %p695_p13 }
  0x1a   : > { %s175_s8 = scalar_lea.hbm %s808_s0, %s404_s30  ;;  %s477_s25 = scalar_lea.hbm %s808_s0, 16 }
  0x1b   : > { %s177_s9 = sshll.u32 %s175_s8, 4  ;;  %s178_s9 = int_to_ptr.hbm [resolvable:$true] %s177_s9 }
  0x1c   : > { %s470_s14 = sshra.s32 %s178_s9, 4  ;;  %s471_s14 = int_to_ptr.hbm [resolvable:$true] %s470_s14 }
  0x1d   : > { %s472_s20 = scalar_lea.hbm %s471_s14, 8  ;;  %p478_p5 = scmp.lt.s32.totalorder %s471_s14, %s808_s0 }
  0x1e   : > { %p473_p2 = scmp.ne.s32.totalorder %s471_s14, %s472_s20  ;;  %p479_p8 = scmp.lt.s32.totalorder %s477_s25, %s472_s20 }
  0x20   : > { %p475_p4 = pnand %p474_p3, %p473_p2  ;;  %p480_p10 = por %p479_p8, %p478_p5 }
  0x22   : > { %p476_p7 = pneg %p475_p4 }
  0x24   : > { %p481_p9 = pnand %p480_p10, %p476_p7 }
  0x26   : > { %484 = shalt.err (!%p481_p9)
}
  0x27   : > { %424 = dma.hbm_to_vmem [thread:$0]  (!%p695_p13), %s178_s9, 128, %s180_s11, %s168_s13  }
  0x28   : > { %p719_p2 = pnand %p407_p0, %p203_p1  ;;  %s194_s14 = scalar_lea.hbm %s799_s1, %s404_s30 }
  0x29   : > { %s196_s20 = sshll.u32 %s194_s14, 4  ;;  %s190_s23 = scalar_lea.vmem [#allocation5], %s403_s5  ;;  %s197_s20 = int_to_ptr.hbm [resolvable:$true] %s196_s20 }
  0x2a   : > { %s198_s25 = sshll.u32 %s190_s23, 4  ;;  %s187_s6 = scalar_lea.sflag [#allocation6], %s686_s29  ;;  %s199_s25 = int_to_ptr.vmem [resolvable:$true] %s198_s25 }
  0x2b   : > { %s500_s7 = sshra.s32 %s197_s20, 4  ;;  %s507_s13 = scalar_lea.hbm %s799_s1, 16  ;;  %s501_s7 = int_to_ptr.hbm [resolvable:$true] %s500_s7 }
  0x2c   : > { %s502_s0 = scalar_lea.hbm %s501_s7, 8  ;;  %p508_p4 = scmp.lt.s32.totalorder %s501_s7, %s799_s1 }
  0x2d   : > { %p503_p9 = scmp.ne.s32.totalorder %s501_s7, %s502_s0  ;;  %p509_p7 = scmp.lt.s32.totalorder %s507_s13, %s502_s0 }
  0x2f   : > { %p505_p0 = pnand %p503_p9, %p474_p3  ;;  %p510_p5 = por %p509_p7, %p508_p4 }
  0x31   : > { %p506_p1 = pneg %p505_p0 }
  0x33   : > { %p511_p8 = pnand %p510_p5, %p506_p1 }
  0x35   : > { %514 = shalt.err (!%p511_p8)
}
  0x36   : > { %427 = dma.hbm_to_vmem [thread:$0]  (!%p695_p13), %s197_s20, 128, %s199_s25, %s187_s6  }
  0x37   : > { %207 = sbr.rel (%p719_p2) target bundleno = 225 (0xe1), region = 36  ;;  %s741_s29 = sand.u32 (!%p719_p2), 1, %s592_s16  }
  0x38   : > { %s744_s5 = sshll.u32 (!%p719_p2), %s741_s29, 3  ;;  %s210_s22 = scalar_lea.sflag (!%p719_p2), [#allocation3], %s741_s29 }
  0x39   : > { %s213_s0 = scalar_lea.vmem (!%p719_p2), [#allocation2], %s744_s5 }
  0x3c   : > { %575 = dma.done.wait (%p670_p6), %s210_s22, 128  }
  0x3d   : > { %577 = vsyncadd (%p670_p6), %s210_s22, 4294967168  ;;  %s220_s12 = scalar_lea.sflag [#allocation6], %s741_s29  ;;  %s223_s8 = scalar_lea.vmem [#allocation5], %s744_s5 }
  0x3e   : > { %579 = dma.done.wait (%p670_p6), %s220_s12, 128  }
  0x3f   : > { %581 = vsyncadd (%p670_p6), %s220_s12, 4294967168  ;;  %v254_v0 = vld [vmem:[%s213_s0] sm:$0xff]  ;;  %v255_v1 = vld [vmem:[%s223_s8] sm:$0xff]  ;;  %s412_s26 = sshll.u32 %s648_s19, 3  ;;  %s253_s19 = scalar_lea.vmem [#allocation7], %s744_s5 }
  0x40   : > { %v256_v2 = vadd.f32 %v255_v1, %v254_v0  ;;  %v466_v19 = vld [vmem:[%s800_s2] ss:$0 sm:$0xff]  ;;  %s302_s6 = scalar_lea.hbm %s802_s4, %s412_s26  ;;  %s304_s11 = sshll.u32 %s253_s19, 4  ;;  %s305_s11 = int_to_ptr.vmem [resolvable:$true] %s304_s11 }
  0x41   : > { %v467_v22 = vld [vmem:[%s801_s3] ss:$0 sm:$0xff]  ;;  %s306_s13 = sshll.u32 %s302_s6, 4  ;;  %s292_s10 = scalar_lea.sflag [#allocation4], %s741_s29  ;;  %s307_s13 = int_to_ptr.hbm [resolvable:$true] %s306_s13 }
  0x42   : > { %257 = vadd.xlane.f32.xlu0 %v256_v2  ;;  %v259_v3 = vmul.f32 %v256_v2, %v256_v2  ;;  %s544_s30 = sshra.s32 %s307_s13, 4  ;;  %s550_s8 = scalar_lea.hbm %s802_s4, 16  ;;  %s545_s30 = int_to_ptr.hbm [resolvable:$true] %s544_s30 }
  0x43   : > { %s546_s22 = scalar_lea.hbm %s545_s30, 8  ;;  %p551_p10 = scmp.lt.s32.totalorder %s545_s30, %s802_s4 }
  0x44   : > { %p547_p6 = scmp.ne.s32.totalorder %s545_s30, %s546_s22  ;;  %p552_p2 = scmp.lt.s32.totalorder %s550_s8, %s546_s22 }
  0x46   : > { %p548_p13 = pnand %p547_p6, %p677_p11  ;;  %p553_p9 = por %p552_p2, %p551_p10 }
  0x48   : > { %p549_p3 = pneg %p548_p13 }
  0x4a   : > { %260 = vadd.xlane.f32.xlu0 %v259_v3  ;;  %p554_p0 = pnand %p553_p9, %p549_p3 }
  0xb5   : > { %v258_v4 = vpop.xlane.xlu0 %257 }
  0xb6   : > { %v262_v5 = vmul.f32 0.0078125, %v258_v4 }
  0xb8   : > { %v264_v7 = vmul.f32 %v262_v5, %v262_v5  ;;  %v278_v18 = vsub.f32 %v256_v2, %v262_v5 }
  0xbd   : > { %v261_v6 = vpop.xlane.xlu0 %260 }
  0xbe   : > { %v263_v8 = vmul.f32 0.0078125, %v261_v6 }
  0xc0   : > { %v265_v9 = vsub.f32 %v263_v8, %v264_v7 }
  0xc2   : > { %v266_v10 = vmax.f32 %v265_v9, 0.0 }
  0xc4   : > { %v267_v11 = vadd.f32 1e-05, %v266_v10 }
  0xc6   : > { %468 = vrsqrt.f32 %v267_v11  ;;  %vm274_vm1 = vweird.f32 %v267_v11 }
  0xcc   : > { %v469_v12 = vpop.eup %468 }
  0xcd   : > { %v269_v13 = vmul.f32 %v469_v12, %v267_v11  ;;  %vm275_vm0 = vweird.f32 %v469_v12 }
  0xce   : > { %vm276_vm2 = vmor %vm274_vm1, %vm275_vm0 }
  0xcf   : > { %v270_v14 = vmul.f32 %v469_v12, %v269_v13 }
  0xd1   : > { %v271_v15 = vmul.f32 0.5, %v270_v14 }
  0xd3   : > { %v272_v16 = vsub.f32 1.5, %v271_v15 }
  0xd5   : > { %v273_v17 = vmul.f32 %v469_v12, %v272_v16 }
  0xd7   : > { %v277_v20 = vsel %vm276_vm2, %v469_v12, %v273_v17 }
  0xd8   : > { %v279_v21 = vmul.f32 %v278_v18, %v277_v20 }
  0xda   : > { %v284_v23 = vmul.f32 %v466_v19, %v279_v21 }
  0xdc   : > { %v289_v24 = vadd.f32 %v467_v22, %v284_v23 }
  0xde   : > { %290 = vst [vmem:[%s253_s19] sm:$0xff] %v289_v24 }
  0xdf   : > { %557 = shalt.err (!%p554_p0)
}
  0xe0   : > { %419 = dma.vmem_to_hbm [thread:$0]  (%p677_p11), %s305_s11, 128, %s307_s13, %s292_s10  }
  0xe1 PF: > { %s318_s29 = sand.u32 1, %s588_s15   ;;  %p811_p1 = scmp.ge.s32.totalorder %s600_s18, 2 }
  0xe2   : > { %s319_s14 = scalar_lea.sflag [#allocation4], %s318_s29 }
  0xe3   : > { %p429_p4 = pnand %p811_p1, %p681_p12 }
  0xe5   : > { %p430_p7 = pneg %p429_p4 }
  0xe7   : > { %583 = dma.done.wait (%p430_p7), %s319_s14, 128  }
  0xe8   : > { %585 = vsyncadd (%p430_p7), %s319_s14, 4294967168  ;;  %p20_p5 = scmp.ge.s32.totalorder %s652_s21, 4   ;;  %s812_s15 = smov %s592_s16 }
  0xe9   : > { %s813_s16 = smov %s596_s17  ;;  %s814_s17 = smov %s664_s24 }
  0xea   : > { %s815_s18 = smov %s652_s21  ;;  %22 = sbr.rel (!%p20_p5) target bundleno = 9 (0x9), region = 94 }
  0xef   :  { %325 = vsyncpa [#allocation3], 1 }
  0xf0   :  { %327 = vsyncpa [#allocation3 + $0x1], 1 }
  0xf1   :  { %328 = vsyncpa [#allocation6], 1 }
  0xf2   :  { %330 = vsyncpa [#allocation6 + $0x1], 1 }
  0xf3   :  { %331 = vsyncpa [#allocation4], 1 }
  0xf4   :  { %333 = vsyncpa [#allocation4 + $0x1], 1 }

</bundles_post_ra>
